<compile_context>
chip_gen: v5e
topology: v5e:2x2
jax: 0.10.0
libtpu: 0.0.40
codegen_flags: <defaults>
</compile_context>

<pallas_src>
import functools

import jax
import jax.numpy as jnp
from jax import lax
from jax.experimental import pallas as pl
from jax.experimental.pallas import tpu as pltpu


def _tv_kernel(x_ref, hsum_ref, wsum_ref, *, rows_per_image):
    """Per-block partial sums of squared forward differences.

    x_ref    : (1, RB, C) tile; RB = TB * rows_per_image (TB whole images stacked
               along the row / sublane axis).
    hsum_ref : (1, 8, 128) scalar partial sum (splat) of row-direction squared diffs.
    wsum_ref : (1, 8, 128) scalar partial sum (splat) of col-direction squared diffs.
    """
    x = x_ref[0].astype(jnp.float32)                 # (RB, C)
    rb, c = x.shape
    r = rows_per_image
    tb = rb // r

    # Neighbour values via XLU rotations; everything stays full (RB, C) shaped.
    nxt_row = pltpu.roll(x, shift=rb - 1, axis=0)    # x[(i + 1) % RB, :]
    nxt_col = pltpu.roll(x, shift=c - 1, axis=1)     # x[:, (j + 1) % C]

    # Row diff is only valid when the neighbour row belongs to the same image
    # (local row < r - 1); col diff only for columns < c - 1 (mask wrapped column).
    local_row = lax.broadcasted_iota(jnp.int32, (tb, r, c), 1).reshape(rb, c)
    col_id = lax.broadcasted_iota(jnp.int32, (rb, c), 1)

    dr = jnp.where(local_row < r - 1, nxt_row - x, 0.0)
    dc = jnp.where(col_id < c - 1, nxt_col - x, 0.0)

    hsum_ref[...] = jnp.broadcast_to(jnp.sum(dr * dr), hsum_ref.shape)
    wsum_ref[...] = jnp.broadcast_to(jnp.sum(dc * dc), wsum_ref.shape)


def illumination_smoothness_loss(x, loss_weight=1.0, *, tile_bytes=2 * 1024 * 1024):
    """Matches IlluminationSmoothnessLoss.forward for NCHW input."""
    B, C, H, W = x.shape
    N = B * C
    itemsize = jnp.dtype(x.dtype).itemsize

    xr = x.reshape(N, H, W)
    # Lane density: keep the longer spatial dim on the 128-lane (last) axis.
    transposed = (W < 128) and (H > W)
    if transposed:
        xr = jnp.swapaxes(xr, 1, 2)
    R, Cc = int(xr.shape[1]), int(xr.shape[2])

    # Fuse as many whole images per grid step as fit in ~tile_bytes (TB divides N so
    # blocks tile the array exactly; last-two block dims always equal the full dims).
    per_img = R * Cc * itemsize
    cap = max(1, tile_bytes // per_img)
    TB = 1
    for d in range(min(N, cap), 0, -1):
        if N % d == 0:
            TB = d
            break
    num_blocks = N // TB
    RB = TB * R

    xb = xr.reshape(num_blocks, RB, Cc)

    kernel = functools.partial(_tv_kernel, rows_per_image=R)

    n_elem = N * H * W
    cost = pl.CostEstimate(
        flops=8 * n_elem,
        transcendentals=0,
        bytes_accessed=n_elem * itemsize + 2 * num_blocks * 8 * 128 * 4,
    )

    # 32 MiB scoped VMEM is safe on v5e/v6e/v7x and leaves headroom for the
    # double-buffered input tile plus full-tile temporaries.
    # TODO(synk): for single frames much larger than the tile budget (esp. v7x's 64 MiB
    # physical VMEM), add an H-chunk grid axis with a 1-row overlap instead of raising
    # the limit further.
    vmem_limit = int(min(max(32 * 1024 * 1024, 8 * TB * per_img), 64 * 1024 * 1024))

    row_par, col_par = pl.pallas_call(
        kernel,
        out_shape=(
            jax.ShapeDtypeStruct((num_blocks, 8, 128), jnp.float32),
            jax.ShapeDtypeStruct((num_blocks, 8, 128), jnp.float32),
        ),
        grid_spec=pltpu.PrefetchScalarGridSpec(
            num_scalar_prefetch=0,
            grid=(num_blocks,),
            in_specs=[pl.BlockSpec((1, RB, Cc), lambda i: (i, 0, 0))],
            out_specs=[
                pl.BlockSpec((1, 8, 128), lambda i: (i, 0, 0)),
                pl.BlockSpec((1, 8, 128), lambda i: (i, 0, 0)),
            ],
        ),
        compiler_params=pltpu.CompilerParams(
            # Per-block partial outputs -> no carried state, so the grid axis can be
            # sharded across TensorCores (v7x megacore); harmless on v5e/v6e.
            dimension_semantics=("parallel",),
            vmem_limit_bytes=vmem_limit,
        ),
        cost_estimate=cost,
    )(xb)

    row_tv = jnp.sum(row_par[:, 0, 0])   # squared diffs along xr's row axis
    col_tv = jnp.sum(col_par[:, 0, 0])   # squared diffs along xr's column axis
    if transposed:
        h_tv, w_tv = col_tv, row_tv
    else:
        h_tv, w_tv = row_tv, col_tv

    count_h = (H - 1) * W
    count_w = H * (W - 1)
    return (loss_weight * 2.0 * (h_tv / count_h + w_tv / count_w) / B).astype(jnp.float32)


def _reference(x, loss_weight=1.0):
    """Pure-JAX reference mirroring the PyTorch forward."""
    B, _, H, W = x.shape
    count_h = (H - 1) * W
    count_w = H * (W - 1)
    h_tv = jnp.sum((x[:, :, 1:, :] - x[:, :, :-1, :]) ** 2)
    w_tv = jnp.sum((x[:, :, :, 1:] - x[:, :, :, :-1]) ** 2)
    return loss_weight * 2.0 * (h_tv / count_h + w_tv / count_w) / B


if __name__ == "__main__":
    key = jax.random.PRNGKey(0)

    # Primary small NCHW test (Zero-DCE illumination map).
    x = jax.random.uniform(key, (2, 4, 16, 16), dtype=jnp.float32)
    loss = jax.block_until_ready(illumination_smoothness_loss(x, loss_weight=1.0))
    ref = _reference(x, loss_weight=1.0)
    assert jnp.allclose(loss, ref, rtol=1e-5, atol=1e-5), (loss, ref)

    # Multi-block path: several images per tile AND several tiles per grid
    # (exercises cross-image masking inside a tile + per-block partial reduction).
    x2 = jax.random.uniform(jax.random.PRNGKey(0), (2, 3, 16, 24), dtype=jnp.float32)
    loss2 = jax.block_until_ready(
        illumination_smoothness_loss(x2, loss_weight=0.5, tile_bytes=4096))
    ref2 = _reference(x2, loss_weight=0.5)
    assert jnp.allclose(loss2, ref2, rtol=1e-5, atol=1e-5), (loss2, ref2)

    # Lane-density transpose path (W < 128 and H > W).
    x3 = jax.random.uniform(jax.random.PRNGKey(0), (1, 2, 64, 16), dtype=jnp.float32)
    loss3 = jax.block_until_ready(illumination_smoothness_loss(x3, loss_weight=1.0))
    ref3 = _reference(x3, loss_weight=1.0)
    assert jnp.allclose(loss3, ref3, rtol=1e-5, atol=1e-5), (loss3, ref3)

    print("KERNEL_OK")
</pallas_src>

<mosaic_0001>
module attributes {stable_mosaic.version = 11 : i64} {
  func.func @_tv_kernel(%arg0: i32, %arg1: memref<1x128x16xf32, #tpu.memory_space<vmem>>, %arg2: memref<1x8x128xf32, #tpu.memory_space<vmem>>, %arg3: memref<1x8x128xf32, #tpu.memory_space<vmem>>) attributes {dimension_semantics = [#tpu.dimension_semantics<parallel>], iteration_bounds = array<i64: 1>, scalar_prefetch = 0 : i64, scratch_operands = 0 : i64, tpu.core_type = #tpu.core_type<tc>, window_params = [{transform_indices = @transform_0, window_bounds = array<i64: 1, 128, 16>}, {transform_indices = @transform_1, window_bounds = array<i64: 1, 8, 128>}, {transform_indices = @transform_2, window_bounds = array<i64: 1, 8, 128>}]} {
    %c0 = arith.constant 0 : index
    %c0_0 = arith.constant 0 : index
    %c0_1 = arith.constant 0 : index
    %0 = vector.load %arg1[%c0, %c0_0, %c0_1] : memref<1x128x16xf32, #tpu.memory_space<vmem>>, vector<1x128x16xf32>
    %1 = vector.shape_cast %0 : vector<1x128x16xf32> to vector<128x16xf32>
    %c127_i32 = arith.constant 127 : i32
    %2 = tpu.dynamic_rotate %1 by %c127_i32 dim 0 : vector<128x16xf32>, i32 -> vector<128x16xf32>
    %c15_i32 = arith.constant 15 : i32
    %3 = tpu.dynamic_rotate %1 by %c15_i32 dim 1 : vector<128x16xf32>, i32 -> vector<128x16xf32>
    %4 = tpu.iota {dimensions = array<i32: 1>} : vector<8x16x16xi32>
    %5 = vector.shape_cast %4 : vector<8x16x16xi32> to vector<128x16xi32>
    %6 = tpu.iota {dimensions = array<i32: 1>} : vector<128x16xi32>
    %c15_i32_2 = arith.constant 15 : i32
    %7 = vector.broadcast %c15_i32_2 : i32 to vector<128x16xi32>
    %8 = arith.cmpi slt, %5, %7 : vector<128x16xi32>
    %9 = arith.subf %2, %1 : vector<128x16xf32>
    %cst = arith.constant 0.000000e+00 : f32
    %10 = vector.broadcast %cst : f32 to vector<128x16xf32>
    %11 = arith.select %8, %9, %10 : vector<128x16xi1>, vector<128x16xf32>
    %c15_i32_3 = arith.constant 15 : i32
    %12 = vector.broadcast %c15_i32_3 : i32 to vector<128x16xi32>
    %13 = arith.cmpi slt, %6, %12 : vector<128x16xi32>
    %14 = arith.subf %3, %1 : vector<128x16xf32>
    %cst_4 = arith.constant 0.000000e+00 : f32
    %15 = vector.broadcast %cst_4 : f32 to vector<128x16xf32>
    %16 = arith.select %13, %14, %15 : vector<128x16xi1>, vector<128x16xf32>
    %17 = arith.mulf %11, %11 : vector<128x16xf32>
    %18 = vector.shape_cast %17 : vector<128x16xf32> to vector<1x128x16xf32>
    %cst_5 = arith.constant dense<0.000000e+00> : vector<1xf32>
    %19 = vector.multi_reduction <add>, %18, %cst_5 [1, 2] : vector<1x128x16xf32> to vector<1xf32>
    %20 = vector.shape_cast %19 : vector<1xf32> to vector<1x1x1xf32>
    %21 = vector.extract %20[0, 0, 0] : f32 from vector<1x1x1xf32>
    %22 = vector.broadcast %21 : f32 to vector<1x8x128xf32>
    %c0_6 = arith.constant 0 : index
    %c0_7 = arith.constant 0 : index
    %c0_8 = arith.constant 0 : index
    %23 = vector.load %arg2[%c0_6, %c0_7, %c0_8] : memref<1x8x128xf32, #tpu.memory_space<vmem>>, vector<1x8x128xf32>
    tpu.vector_store %arg2[%c0_6, %c0_7, %c0_8], %22 {strides = array<i32>} : memref<1x8x128xf32, #tpu.memory_space<vmem>>, vector<1x8x128xf32>,
    %24 = arith.mulf %16, %16 : vector<128x16xf32>
    %25 = vector.shape_cast %24 : vector<128x16xf32> to vector<1x128x16xf32>
    %cst_9 = arith.constant dense<0.000000e+00> : vector<1xf32>
    %26 = vector.multi_reduction <add>, %25, %cst_9 [1, 2] : vector<1x128x16xf32> to vector<1xf32>
    %27 = vector.shape_cast %26 : vector<1xf32> to vector<1x1x1xf32>
    %28 = vector.extract %27[0, 0, 0] : f32 from vector<1x1x1xf32>
    %29 = vector.broadcast %28 : f32 to vector<1x8x128xf32>
    %c0_10 = arith.constant 0 : index
    %c0_11 = arith.constant 0 : index
    %c0_12 = arith.constant 0 : index
    %30 = vector.load %arg3[%c0_10, %c0_11, %c0_12] : memref<1x8x128xf32, #tpu.memory_space<vmem>>, vector<1x8x128xf32>
    tpu.vector_store %arg3[%c0_10, %c0_11, %c0_12], %29 {strides = array<i32>} : memref<1x8x128xf32, #tpu.memory_space<vmem>>, vector<1x8x128xf32>,
    return
  }
  func.func @transform_0(%arg0: i32) -> (i32, i32, i32) {
    %c0_i32 = arith.constant 0 : i32
    %c0_i32_0 = arith.constant 0 : i32
    %c0_i32_1 = arith.constant 0 : i32
    return %arg0, %c0_i32, %c0_i32_0 : i32, i32, i32
  }
  func.func @transform_1(%arg0: i32) -> (i32, i32, i32) {
    %c0_i32 = arith.constant 0 : i32
    %c0_i32_0 = arith.constant 0 : i32
    %c0_i32_1 = arith.constant 0 : i32
    return %arg0, %c0_i32, %c0_i32_0 : i32, i32, i32
  }
  func.func @transform_2(%arg0: i32) -> (i32, i32, i32) {
    %c0_i32 = arith.constant 0 : i32
    %c0_i32_0 = arith.constant 0 : i32
    %c0_i32_1 = arith.constant 0 : i32
    return %arg0, %c0_i32, %c0_i32_0 : i32, i32, i32
  }
}

</mosaic_0001>

<bundles_post_ra>
// kernel: tpu_custom_call.1
= control target key start
LH: loop header
LB: loop body
LE: loop exit
PB: predicated region body
PF: predicated region fallthrough
CT: control target
= control target key end

     0   :  { %8 = vsyncpa [#allocation3], 0  ;;  %s568_s15 = smov 16   ;;  %s994_s0 = inlined_call_operand.vmem [shape: f32[1,128,16], index: 0, kind: input, shape index: {}]   ;;  %s995_s1 = inlined_call_operand.hbm [shape: f32[1,8,128], index: 1, kind: output, shape index: {0}]   ;;  %s996_s2 = inlined_call_operand.hbm [shape: f32[1,8,128], index: 2, kind: output, shape index: {1}]  }
   0x1   :  { %v591_v0 = vld [vmem:[%s994_s0 + $0x20] sm:$0xff]  ;;  %v596_v1 = vld [vmem:[%s994_s0 + $0x10] sm:$0xff] }
   0x2   :  { %v601_v2 = vld [vmem:[%s994_s0] sm:$0xff]  ;;  %76 = vrot.lane.b32.xlu2 %v591_v0, %s568_s15  ;;  %70 = vrot.lane.b32.xlu1 %v596_v1, %s568_s15 }
   0x3   :  { %64 = vrot.lane.b32.xlu0 %v601_v2, %s568_s15 }
   0x4   :  { %9 = vsyncpa [#allocation5], 0  ;;  %v612_v3 = vld [vmem:[%s994_s0 + $0x18] sm:$0xff]  ;;  %v617_v4 = vld [vmem:[%s994_s0 + $0x8] sm:$0xff]  ;;  %s569_s12 = smov 1   ;;  %vm63_vm0 = vcmask 1047680  }
   0x5   :  { %v626_v5 = vld [vmem:[%s994_s0 + $0x28] sm:$0xff]  ;;  %v633_v6 = vld [vmem:[%s994_s0 + $0x38] sm:$0xff]  ;;  %v638_v7 = vld [vmem:[%s994_s0 + $0x30] sm:$0xff]  ;;  %vm374_vm3 = vcmask 130048   ;;  %s482_s19 = sshll.u32 %s995_s1, 4  ;;  %s572_s21 = smov [#allocation4]   ;;  %s483_s19 = int_to_ptr.hbm [resolvable:$true] %s482_s19 }
   0x6   :  { %v647_v8 = vld [vmem:[%s994_s0 + $0x40] sm:$0xff]  ;;  %v654_v9 = vld [vmem:[%s994_s0 + $0x50] sm:$0xff]  ;;  %v659_v10 = vld [vmem:[%s994_s0 + $0x48] sm:$0xff]  ;;  %s491_s22 = sshll.u32 %s572_s21, 4  ;;  %s493_s25 = sshll.u32 %s996_s2, 4  ;;  %s492_s22 = int_to_ptr.vmem [resolvable:$true] %s491_s22  ;;  %s494_s25 = int_to_ptr.hbm [resolvable:$true] %s493_s25 }
   0x7   :  { %v668_v11 = vld [vmem:[%s994_s0 + $0x58] sm:$0xff]  ;;  %v675_v12 = vld [vmem:[%s994_s0 + $0x68] sm:$0xff]  ;;  %v680_v13 = vld [vmem:[%s994_s0 + $0x60] sm:$0xff] }
   0x8   :  { %v689_v14 = vld [vmem:[%s994_s0 + $0x78] sm:$0xff]  ;;  %v698_v15 = vld [vmem:[%s994_s0 + $0x70] sm:$0xff]  ;;  %s570_s0 = smov 127  }
   0xa   :  { %73 = vrot.lane.b32.xlu1 %v612_v3, %s568_s15  ;;  %79 = vrot.lane.b32.xlu2 %v626_v5, %s568_s15 }
   0xb   :  { %67 = vrot.lane.b32.xlu0 %v617_v4, %s568_s15 }
  0x12   :  { %85 = vrot.lane.b32.xlu1 %v633_v6, %s568_s15  ;;  %88 = vrot.lane.b32.xlu2 %v647_v8, %s568_s15 }
  0x13   :  { %82 = vrot.lane.b32.xlu0 %v638_v7, %s568_s15 }
  0x1a   :  { %94 = vrot.lane.b32.xlu1 %v654_v9, %s568_s15  ;;  %97 = vrot.lane.b32.xlu2 %v668_v11, %s568_s15 }
  0x1b   :  { %91 = vrot.lane.b32.xlu0 %v659_v10, %s568_s15 }
  0x22   :  { %103 = vrot.lane.b32.xlu1 %v675_v12, %s568_s15  ;;  %106 = vrot.lane.b32.xlu2 %v698_v15, %s568_s15 }
  0x23   :  { %100 = vrot.lane.b32.xlu0 %v680_v13, %s568_s15 }
  0x2a   :  { %216 = vrot.lane.b32.xlu1 %v617_v4, %s569_s12  ;;  %220 = vrot.lane.b32.xlu2 %v612_v3, %s569_s12 }
  0x2b   :  { %109 = vrot.lane.b32.xlu0 %v689_v14, %s568_s15 }
  0x32   :  { %222 = vrot.lane.b32.xlu1 %v591_v0, %s569_s12  ;;  %226 = vrot.lane.b32.xlu2 %v638_v7, %s569_s12 }
  0x33   :  { %214 = vrot.lane.b32.xlu0 %v601_v2, %s569_s12 }
  0x3a   :  { %228 = vrot.lane.b32.xlu1 %v633_v6, %s569_s12  ;;  %232 = vrot.lane.b32.xlu2 %v659_v10, %s569_s12 }
  0x3b   :  { %218 = vrot.lane.b32.xlu0 %v596_v1, %s569_s12 }
  0x42   :  { %234 = vrot.lane.b32.xlu1 %v654_v9, %s569_s12  ;;  %238 = vrot.lane.b32.xlu2 %v680_v13, %s569_s12 }
  0x43   :  { %224 = vrot.lane.b32.xlu0 %v626_v5, %s569_s12 }
  0x4a   :  { %240 = vrot.lane.b32.xlu1 %v675_v12, %s569_s12 }
  0x4b   :  { %230 = vrot.lane.b32.xlu0 %v647_v8, %s569_s12 }
  0x53   :  { %236 = vrot.lane.b32.xlu0 %v668_v11, %s569_s12 }
  0x5c   :  { %v77_v16 = vpop.permute.xlu2 %76 }
  0x5d   :  { %v78_v17 = vsel %vm63_vm0, %v77_v16, %v591_v0 }
  0x5e   :  { %120 = vrot.lane.b32.xlu0 %v78_v17, %s568_s15 }
  0x64   :  { %v80_v28 = vpop.permute.xlu2 %79 }
  0x65   :  { %v81_v32 = vsel %vm63_vm0, %v80_v28, %v626_v5 }
  0x6c   :  { %v89_v36 = vpop.permute.xlu2 %88 }
  0x6d   :  { %v90_v38 = vsel %vm63_vm0, %v89_v36, %v647_v8 }
  0x74   :  { %v71_v18 = vpop.permute.xlu1 %70  ;;  %v98_v42 = vpop.permute.xlu2 %97 }
  0x75   :  { %v65_v19 = vpop.permute.xlu0 %64  ;;  %v72_v29 = vsel %vm63_vm0, %v71_v18, %v596_v1  ;;  %v99_v43 = vsel %vm63_vm0, %v98_v42, %v668_v11 }
  0x76   :  { %v66_v20 = vsel %vm63_vm0, %v65_v19, %v601_v2 }
  0x77   :  { %112 = vrot.lane.b32.xlu1 %v66_v20, %s568_s15 }
  0x7c   :  { %v74_v21 = vpop.permute.xlu1 %73  ;;  %v107_v46 = vpop.permute.xlu2 %106 }
  0x7d   :  { %v68_v22 = vpop.permute.xlu0 %67  ;;  %v75_v23 = vsel %vm63_vm0, %v74_v21, %v612_v3  ;;  %v108_v47 = vsel %vm63_vm0, %v107_v46, %v698_v15 }
  0x7e   :  { %v69_v24 = vsel %vm63_vm0, %v68_v22, %v617_v4 }
  0x7f   :  { %118 = vrot.lane.b32.xlu1 %v75_v23, %s568_s15  ;;  %114 = vrot.lane.b32.xlu2 %v69_v24, %s568_s15 }
  0x84   :  { %v86_v25 = vpop.permute.xlu1 %85  ;;  %v221_v49 = vpop.permute.xlu2 %220 }
  0x85   :  { %v83_v26 = vpop.permute.xlu0 %82  ;;  %v87_v27 = vsel %vm63_vm0, %v86_v25, %v633_v6 }
  0x86   :  { %126 = vrot.lane.b32.xlu0 %v87_v27, %s568_s15  ;;  %v84_v30 = vsel %vm63_vm0, %v83_v26, %v638_v7 }
  0x87   :  { %116 = vrot.lane.b32.xlu2 %v72_v29, %s568_s15  ;;  %124 = vrot.lane.b32.xlu1 %v84_v30, %s568_s15 }
  0x8c   :  { %v95_v31 = vpop.permute.xlu1 %94  ;;  %v227_v52 = vpop.permute.xlu2 %226 }
  0x8d   :  { %v92_v33 = vpop.permute.xlu0 %91  ;;  %v96_v34 = vsel %vm63_vm0, %v95_v31, %v654_v9 }
  0x8e   :  { %132 = vrot.lane.b32.xlu0 %v96_v34, %s568_s15  ;;  %v93_v35 = vsel %vm63_vm0, %v92_v33, %v659_v10 }
  0x8f   :  { %122 = vrot.lane.b32.xlu2 %v81_v32, %s568_s15  ;;  %130 = vrot.lane.b32.xlu1 %v93_v35, %s568_s15 }
  0x94   :  { %v104_v37 = vpop.permute.xlu1 %103  ;;  %v233_v55 = vpop.permute.xlu2 %232 }
  0x95   :  { %v101_v39 = vpop.permute.xlu0 %100  ;;  %v105_v40 = vsel %vm63_vm0, %v104_v37, %v675_v12 }
  0x96   :  { %138 = vrot.lane.b32.xlu0 %v105_v40, %s568_s15  ;;  %v102_v41 = vsel %vm63_vm0, %v101_v39, %v680_v13 }
  0x97   :  { %128 = vrot.lane.b32.xlu2 %v90_v38, %s568_s15  ;;  %136 = vrot.lane.b32.xlu1 %v102_v41, %s568_s15 }
  0x9c   :  { %v217_v51 = vpop.permute.xlu1 %216  ;;  %v239_v58 = vpop.permute.xlu2 %238 }
  0x9d   :  { %v110_v44 = vpop.permute.xlu0 %109 }
  0x9e   :  { %242 = vrot.lane.b32.xlu0 %v698_v15, %s569_s12  ;;  %v111_v45 = vsel %vm63_vm0, %v110_v44, %v689_v14 }
  0x9f   :  { %134 = vrot.lane.b32.xlu2 %v99_v43, %s568_s15  ;;  %142 = vrot.lane.b32.xlu1 %v111_v45, %s568_s15 }
  0xa4   :  { %v223_v54 = vpop.permute.xlu1 %222 }
  0xa5   :  { %v215_v48 = vpop.permute.xlu0 %214 }
  0xa7   :  { %140 = vrot.lane.b32.xlu2 %v108_v47, %s568_s15  ;;  %s571_s15 = smov [#allocation2]  }
  0xa8   :  { %s480_s16 = sshll.u32 %s571_s15, 4  ;;  %s481_s16 = int_to_ptr.vmem [resolvable:$true] %s480_s16 }
  0xac   :  { %v229_v57 = vpop.permute.xlu1 %228 }
  0xad   :  { %v219_v50 = vpop.permute.xlu0 %218 }
  0xaf   :  { %244 = vrot.lane.b32.xlu2 %v689_v14, %s569_s12 }
  0xb4   :  { %v235_v60 = vpop.permute.xlu1 %234 }
  0xb5   :  { %v225_v53 = vpop.permute.xlu0 %224 }
  0xbc   :  { %v241_v17 = vpop.permute.xlu1 %240 }
  0xbd   :  { %v231_v56 = vpop.permute.xlu0 %230 }
  0xc5   :  { %v237_v59 = vpop.permute.xlu0 %236 }
  0xd0   :  { %v121_v16 = vpop.permute.xlu0 %120 }
  0xd1   :  { %v148_v18 = vsel %vm63_vm0, %v121_v16, %v591_v0 }
  0xd2   :  { %v266_v21 = vsub.f32 %v148_v18, %v223_v54  ;;  %v30_v18 = vrot.slane %v596_v1, 1 }
  0xd9   :  { %v115_v61 = vpop.permute.xlu2 %114 }
  0xda   :  { %v145_v62 = vsel %vm63_vm0, %v115_v61, %v617_v4 }
  0xdb   :  { %v263_v63 = vsub.f32 %v145_v62, %v217_v51 }
  0xdd   :  { %296 = vrot.lane.b32.xlu1 %v263_v63, %s570_s0 }
  0xe1   :  { %v117_v19 = vpop.permute.xlu2 %116 }
  0xe2   :  { %v146_v20 = vsel %vm63_vm0, %v117_v19, %v596_v1  ;;  %v29_v19 = vrot.slane %v617_v4, 1 }
  0xe3   :  { %v264_v22 = vsub.f32 %v146_v20, %v219_v50  ;;  %v32_v20 = vrot.slane %v591_v0, 1 }
  0xe5   :  { %298 = vrot.lane.b32.xlu2 %v264_v22, %s570_s0  ;;  %302 = vrot.lane.b32.xlu1 %v266_v21, %s570_s0  ;;  %v31_v21 = vrot.slane %v612_v3, 1 }
  0xe9   :  { %v113_v23 = vpop.permute.xlu1 %112  ;;  %v123_v24 = vpop.permute.xlu2 %122 }
  0xea   :  { %v144_v25 = vsel %vm63_vm0, %v113_v23, %v601_v2  ;;  %v149_v26 = vsel %vm63_vm0, %v123_v24, %v626_v5 }
  0xeb   :  { %v262_v27 = vsub.f32 %v144_v25, %v215_v48  ;;  %v267_v28 = vsub.f32 %v149_v26, %v225_v53  ;;  %v34_v26 = vrot.slane %v638_v7, 1 }
  0xed   :  { %294 = vrot.lane.b32.xlu0 %v262_v27, %s570_s0  ;;  %304 = vrot.lane.b32.xlu2 %v267_v28, %s570_s0  ;;  %v33_v27 = vrot.slane %v626_v5, 1 }
  0xf1   :  { %v119_v29 = vpop.permute.xlu1 %118  ;;  %v129_v30 = vpop.permute.xlu2 %128 }
  0xf2   :  { %v147_v31 = vsel %vm63_vm0, %v119_v29, %v612_v3  ;;  %v152_v32 = vsel %vm63_vm0, %v129_v30, %v647_v8 }
  0xf3   :  { %v265_v33 = vsub.f32 %v147_v31, %v221_v49  ;;  %v270_v34 = vsub.f32 %v152_v32, %v231_v56  ;;  %v35_v32 = vrot.slane %v633_v6, 1 }
  0xf5   :  { %300 = vrot.lane.b32.xlu0 %v265_v33, %s570_s0  ;;  %310 = vrot.lane.b32.xlu2 %v270_v34, %s570_s0  ;;  %v28_v33 = vrot.slane %v601_v2, 1 }
  0xf8   :  { %v127_v35 = vpop.permute.xlu0 %126 }
  0xf9   :  { %v135_v36 = vpop.permute.xlu2 %134  ;;  %v125_v37 = vpop.permute.xlu1 %124  ;;  %v151_v38 = vsel %vm63_vm0, %v127_v35, %v633_v6 }
  0xfa   :  { %v155_v39 = vsel %vm63_vm0, %v135_v36, %v668_v11  ;;  %v150_v40 = vsel %vm63_vm0, %v125_v37, %v638_v7  ;;  %v269_v41 = vsub.f32 %v151_v38, %v229_v57 }
  0xfb   :  { %v273_v42 = vsub.f32 %v155_v39, %v237_v59  ;;  %v268_v43 = vsub.f32 %v150_v40, %v227_v52 }
  0xfc   :  { %308 = vrot.lane.b32.xlu1 %v269_v41, %s570_s0 }
  0xfd   :  { %306 = vrot.lane.b32.xlu0 %v268_v43, %s570_s0  ;;  %316 = vrot.lane.b32.xlu2 %v273_v42, %s570_s0  ;;  %v37_v43 = vrot.slane %v659_v10, 1 }
 0x100   :  { %v133_v44 = vpop.permute.xlu0 %132 }
 0x101   :  { %v131_v45 = vpop.permute.xlu1 %130  ;;  %v154_v46 = vsel %vm63_vm0, %v133_v44, %v654_v9  ;;  %v141_v50 = vpop.permute.xlu2 %140 }
 0x102   :  { %v153_v47 = vsel %vm63_vm0, %v131_v45, %v659_v10  ;;  %v272_v48 = vsub.f32 %v154_v46, %v235_v60  ;;  %v36_v46 = vrot.slane %v647_v8, 1 }
 0x103   :  { %v271_v49 = vsub.f32 %v153_v47, %v233_v55  ;;  %v158_v55 = vsel %vm63_vm0, %v141_v50, %v698_v15 }
 0x104   :  { %314 = vrot.lane.b32.xlu1 %v272_v48, %s570_s0  ;;  %v38_v48 = vrot.slane %v654_v9, 1 }
 0x105   :  { %312 = vrot.lane.b32.xlu0 %v271_v49, %s570_s0 }
 0x108   :  { %v139_v51 = vpop.permute.xlu0 %138 }
 0x109   :  { %v137_v52 = vpop.permute.xlu1 %136  ;;  %v157_v53 = vsel %vm63_vm0, %v139_v51, %v675_v12  ;;  %v245_v60 = vpop.permute.xlu2 %244 }
 0x10a   :  { %v156_v54 = vsel %vm63_vm0, %v137_v52, %v680_v13  ;;  %v275_v56 = vsub.f32 %v157_v53, %v241_v17 }
 0x10b   :  { %v274_v57 = vsub.f32 %v156_v54, %v239_v58  ;;  %v44_v58 = vlaneseq }
 0x10c   :  { %320 = vrot.lane.b32.xlu1 %v275_v56, %s570_s0 }
 0x10d   :  { %318 = vrot.lane.b32.xlu0 %v274_v57, %s570_s0  ;;  %v829_v17 = vshrl.u32 %v44_v58, 7 }
 0x10f   :  { %vm46_vm1 = vcmp.lt.s32.totalorder %v829_v17, 7  ;;  %v837_v22 = vadd.s32 8, %v829_v17 }
 0x110   :  { %v243_v59 = vpop.permute.xlu0 %242  ;;  %v60_v23 = vsel %vm46_vm1, %v29_v19, %v30_v18  ;;  %v58_v25 = vsel %vm46_vm1, %v31_v21, %v32_v20  ;;  %v59_v28 = vsel %vm46_vm1, %v30_v18, %v31_v21  ;;  %v61_v37 = vsel %vm46_vm1, %v28_v33, %v29_v19 }
 0x111   :  { %v143_v61 = vpop.permute.xlu1 %142  ;;  %v276_v62 = vsub.f32 %v158_v55, %v243_v59  ;;  %v166_v24 = vsub.f32 %v60_v23, %v617_v4  ;;  %vm164_vm2 = vcmp.lt.s32.totalorder %v837_v22, 15  ;;  %v168_v29 = vsub.f32 %v58_v25, %v612_v3 }
 0x112   :  { %v159_v63 = vsel %vm63_vm0, %v143_v61, %v689_v14  ;;  %v56_v4 = vsel %vm46_vm1, %v33_v27, %v34_v26  ;;  %v167_v31 = vsub.f32 %v59_v28, %v596_v1  ;;  %v57_v3 = vsel %vm46_vm1, %v32_v20, %v33_v27 }
 0x113   :  { %v277_v16 = vsub.f32 %v159_v63, %v245_v60  ;;  %322 = vrot.lane.b32.xlu2 %v276_v62, %s570_s0  ;;  %v182_v30 = vsel %vm164_vm2, %v166_v24, 0.0  ;;  %v184_v35 = vsel %vm164_vm2, %v168_v29, 0.0  ;;  %v170_v36 = vsub.f32 %v56_v4, %v626_v5 }
 0x114   :  { %v359_v34 = vmul.f32 %v182_v30, %v182_v30  ;;  %v165_v1 = vsub.f32 %v61_v37, %v601_v2  ;;  %v360_v38 = vmul.f32 %v167_v31, %v167_v31  ;;  %v55_v39 = vsel %vm46_vm1, %v34_v26, %v35_v32 }
 0x115   :  { %324 = vrot.lane.b32.xlu0 %v277_v16, %s570_s0  ;;  %v361_v40 = vmul.f32 %v184_v35, %v184_v35  ;;  %v169_v5 = vsub.f32 %v57_v3, %v591_v0  ;;  %v186_v44 = vsel %vm164_vm2, %v170_v36, 0.0  ;;  %v171_v45 = vsub.f32 %v55_v39, %v638_v7 }
 0x116   :  { %v376_v41 = vsel %vm374_vm3, %v359_v34, 0.0  ;;  %v358_v42 = vmul.f32 %v165_v1, %v165_v1  ;;  %v363_v51 = vmul.f32 %v186_v44, %v186_v44  ;;  %v378_v0 = vsel %vm374_vm3, %v360_v38, 0.0 }
 0x117   :  { %v380_v50 = vsel %vm374_vm3, %v361_v40, 0.0  ;;  %v362_v52 = vmul.f32 %v169_v5, %v169_v5  ;;  %v53_v53 = vsel %vm46_vm1, %v36_v46, %v37_v43  ;;  %v364_v56 = vmul.f32 %v171_v45, %v171_v45 }
 0x118   :  { %v375_v47 = vsel %vm374_vm3, %v358_v42, 0.0  ;;  %v54_v7 = vsel %vm46_vm1, %v35_v32, %v36_v46  ;;  %v52_v55 = vsel %vm46_vm1, %v37_v43, %v38_v48  ;;  %v384_v59 = vsel %vm374_vm3, %v363_v51, 0.0 }
 0x119   :  { %v377_v49 = vadd.f32 %v376_v41, %v375_v47  ;;  %v173_v60 = vsub.f32 %v53_v53, %v647_v8  ;;  %v382_v61 = vsel %vm374_vm3, %v362_v52, 0.0  ;;  %v172_v62 = vsub.f32 %v54_v7, %v633_v6 }
 0x11a   :  { %v386_v16 = vsel %vm374_vm3, %v364_v56, 0.0  ;;  %v174_v18 = vsub.f32 %v52_v55, %v659_v10  ;;  %v39_v19 = vrot.slane %v668_v11, 1  ;;  %v40_v8 = vrot.slane %v680_v13, 1 }
 0x11b   :  { %v379_v54 = vadd.f32 %v378_v0, %v377_v49  ;;  %v188_v20 = vsel %vm164_vm2, %v172_v62, 0.0  ;;  %v366_v23 = vmul.f32 %v173_v60, %v173_v60  ;;  %v898_v6 = vand.u32 127, %v44_v58 }
 0x11c   :  { %v365_v24 = vmul.f32 %v188_v20, %v188_v20  ;;  %v51_v27 = vsel %vm46_vm1, %v38_v48, %v39_v19  ;;  %v190_v10 = vsel %vm164_vm2, %v174_v18, 0.0  ;;  %v50_v29 = vsel %vm46_vm1, %v39_v19, %v40_v8 }
 0x11d   :  { %v381_v57 = vadd.f32 %v380_v50, %v379_v54  ;;  %v175_v30 = vsub.f32 %v51_v27, %v654_v9  ;;  %v367_v4 = vmul.f32 %v190_v10, %v190_v10  ;;  %v390_v31 = vsel %vm374_vm3, %v366_v23, 0.0 }
 0x11e   :  { %v388_v26 = vsel %vm374_vm3, %v365_v24, 0.0  ;;  %v41_v32 = vrot.slane %v675_v12, 1  ;;  %v176_v58 = vsub.f32 %v50_v29, %v668_v11  ;;  %v42_v36 = vrot.slane %v698_v15, 1 }
 0x11f   :  { %v383_v63 = vadd.f32 %v382_v61, %v381_v57  ;;  %v368_v3 = vmul.f32 %v175_v30, %v175_v30  ;;  %v392_v9 = vsel %vm374_vm3, %v367_v4, 0.0  ;;  %vm197_vm4 = vcmp.lt.s32.totalorder %v898_v6, 15 }
 0x120   :  { %v49_v37 = vsel %vm46_vm1, %v40_v8, %v41_v32  ;;  %v192_v1 = vsel %vm164_vm2, %v176_v58, 0.0  ;;  %v48_v39 = vsel %vm46_vm1, %v41_v32, %v42_v36  ;;  %v43_v40 = vrot.slane %v689_v14, 1 }
 0x121   :  { %v385_v21 = vadd.f32 %v384_v59, %v383_v63  ;;  %v177_v11 = vsub.f32 %v49_v37, %v680_v13  ;;  %v178_v41 = vsub.f32 %v48_v39, %v675_v12  ;;  %v369_v5 = vmul.f32 %v192_v1, %v192_v1 }
 0x122   :  { %v394_v45 = vsel %vm374_vm3, %v368_v3, 0.0  ;;  %v47_v46 = vsel %vm46_vm1, %v42_v36, %v43_v40  ;;  %v62_v12 = vsel %vm46_vm1, %v43_v40, %v28_v33 }
 0x123   :  { %v387_v25 = vadd.f32 %v386_v16, %v385_v21  ;;  %v370_v44 = vmul.f32 %v177_v11, %v177_v11  ;;  %v194_v47 = vsel %vm164_vm2, %v178_v41, 0.0  ;;  %v396_v13 = vsel %vm374_vm3, %v369_v5, 0.0 }
 0x124   :  { %v179_v50 = vsub.f32 %v47_v46, %v698_v15  ;;  %v371_v51 = vmul.f32 %v194_v47, %v194_v47  ;;  %v180_v53 = vsub.f32 %v62_v12, %v689_v14 }
 0x125   :  { %v389_v28 = vadd.f32 %v388_v26, %v387_v25  ;;  %v398_v52 = vsel %vm374_vm3, %v370_v44, 0.0 }
 0x126   :  { %v372_v57 = vmul.f32 %v179_v50, %v179_v50  ;;  %v400_v55 = vsel %vm374_vm3, %v371_v51, 0.0  ;;  %v196_v15 = vsel %vm164_vm2, %v180_v53, 0.0 }
 0x127   :  { %v391_v38 = vadd.f32 %v390_v31, %v389_v28  ;;  %v373_v61 = vmul.f32 %v196_v15, %v196_v15 }
 0x128   :  { %v402_v14 = vsel %vm374_vm3, %v372_v57, 0.0 }
 0x129   :  { %v393_v42 = vadd.f32 %v392_v9, %v391_v38  ;;  %v404_v18 = vsel %vm374_vm3, %v373_v61, 0.0 }
 0x12b   :  { %v395_v48 = vadd.f32 %v394_v45, %v393_v42 }
 0x12d   :  { %v397_v54 = vadd.f32 %v396_v13, %v395_v48 }
 0x12f   :  { %v399_v17 = vadd.f32 %v398_v52, %v397_v54 }
 0x131   :  { %v401_v62 = vadd.f32 %v400_v55, %v399_v17 }
 0x133   :  { %v403_v22 = vadd.f32 %v402_v14, %v401_v62 }
 0x135   :  { %v405_v24 = vadd.f32 %v404_v18, %v403_v22 }
 0x137   :  { %406 = vadd.xlane.f32.xlu1 %v405_v24 }
 0x13f   :  { %v299_v34 = vpop.permute.xlu2 %298 }
 0x140   :  { %v344_v2 = vsel %vm197_vm4, %v299_v34, 0.0 }
 0x141   :  { %v419_v63 = vmul.f32 %v344_v2, %v344_v2 }
 0x143   :  { %v436_v25 = vsel %vm374_vm3, %v419_v63, 0.0 }
 0x147   :  { %v305_v33 = vpop.permute.xlu2 %304 }
 0x148   :  { %v347_v27 = vsel %vm197_vm4, %v305_v33, 0.0 }
 0x149   :  { %v422_v30 = vmul.f32 %v347_v27, %v347_v27 }
 0x14b   :  { %v442_v3 = vsel %vm374_vm3, %v422_v30, 0.0 }
 0x14f   :  { %v297_v35 = vpop.permute.xlu1 %296  ;;  %v311_v4 = vpop.permute.xlu2 %310 }
 0x150   :  { %v343_v43 = vsel %vm197_vm4, %v297_v35, 0.0  ;;  %v350_v38 = vsel %vm197_vm4, %v311_v4, 0.0 }
 0x151   :  { %v418_v56 = vmul.f32 %v343_v43, %v343_v43  ;;  %v425_v40 = vmul.f32 %v350_v38, %v350_v38 }
 0x153   :  { %v434_v16 = vsel %vm374_vm3, %v418_v56, 0.0  ;;  %v448_v47 = vsel %vm374_vm3, %v425_v40, 0.0 }
 0x157   :  { %v303_v59 = vpop.permute.xlu1 %302  ;;  %v317_v43 = vpop.permute.xlu2 %316 }
 0x158   :  { %v346_v19 = vsel %vm197_vm4, %v303_v59, 0.0 }
 0x159   :  { %v421_v8 = vmul.f32 %v346_v19, %v346_v19 }
 0x15b   :  { %v440_v31 = vsel %vm374_vm3, %v421_v8, 0.0 }
 0x15f   :  { %v295_v49 = vpop.permute.xlu0 %294 }
 0x160   :  { %v342_v0 = vsel %vm197_vm4, %v295_v49, 0.0  ;;  %v353_v49 = vsel %vm197_vm4, %v317_v43, 0.0 }
 0x161   :  { %v417_v7 = vmul.f32 %v342_v0, %v342_v0  ;;  %v428_v52 = vmul.f32 %v353_v49, %v353_v49 }
 0x163   :  { %v433_v60 = vsel %vm374_vm3, %v417_v7, 0.0  ;;  %v454_v2 = vsel %vm374_vm3, %v428_v52, 0.0 }
 0x164   :  { %v435_v20 = vadd.f32 %v434_v16, %v433_v60 }
 0x166   :  { %v437_v10 = vadd.f32 %v436_v25, %v435_v20 }
 0x167   :  { %v301_v21 = vpop.permute.xlu0 %300 }
 0x168   :  { %v345_v23 = vsel %vm197_vm4, %v301_v21, 0.0 }
 0x169   :  { %v420_v26 = vmul.f32 %v345_v23, %v345_v23 }
 0x16b   :  { %v438_v28 = vsel %vm374_vm3, %v420_v26, 0.0 }
 0x16c   :  { %v439_v29 = vadd.f32 %v438_v28, %v437_v10 }
 0x16d   :  { %v323_v56 = vpop.permute.xlu2 %322 }
 0x16e   :  { %v441_v32 = vadd.f32 %v440_v31, %v439_v29  ;;  %v309_v58 = vpop.permute.xlu1 %308  ;;  %v356_v33 = vsel %vm197_vm4, %v323_v56, 0.0 }
 0x16f   :  { %v349_v34 = vsel %vm197_vm4, %v309_v58, 0.0  ;;  %v307_v35 = vpop.permute.xlu0 %306  ;;  %v431_v14 = vmul.f32 %v356_v33, %v356_v33 }
 0x170   :  { %v348_v36 = vsel %vm197_vm4, %v307_v35, 0.0  ;;  %v424_v37 = vmul.f32 %v349_v34, %v349_v34  ;;  %v443_v9 = vadd.f32 %v442_v3, %v441_v32 }
 0x171   :  { %v423_v1 = vmul.f32 %v348_v36, %v348_v36  ;;  %v460_v19 = vsel %vm374_vm3, %v431_v14, 0.0 }
 0x172   :  { %v446_v41 = vsel %vm374_vm3, %v424_v37, 0.0 }
 0x173   :  { %v444_v39 = vsel %vm374_vm3, %v423_v1, 0.0 }
 0x174   :  { %v445_v11 = vadd.f32 %v444_v39, %v443_v9 }
 0x176   :  { %v447_v5 = vadd.f32 %v446_v41, %v445_v11  ;;  %v315_v42 = vpop.permute.xlu1 %314 }
 0x177   :  { %v352_v44 = vsel %vm197_vm4, %v315_v42, 0.0  ;;  %v313_v45 = vpop.permute.xlu0 %312 }
 0x178   :  { %v351_v46 = vsel %vm197_vm4, %v313_v45, 0.0  ;;  %v427_v48 = vmul.f32 %v352_v44, %v352_v44  ;;  %v449_v12 = vadd.f32 %v448_v47, %v447_v5 }
 0x179   :  { %v426_v13 = vmul.f32 %v351_v46, %v351_v46 }
 0x17a   :  { %v452_v0 = vsel %vm374_vm3, %v427_v48, 0.0 }
 0x17b   :  { %v450_v50 = vsel %vm374_vm3, %v426_v13, 0.0 }
 0x17c   :  { %v451_v51 = vadd.f32 %v450_v50, %v449_v12 }
 0x17e   :  { %v453_v53 = vadd.f32 %v452_v0, %v451_v51  ;;  %v321_v54 = vpop.permute.xlu1 %320 }
 0x17f   :  { %v355_v7 = vsel %vm197_vm4, %v321_v54, 0.0  ;;  %v319_v57 = vpop.permute.xlu0 %318 }
 0x180   :  { %v354_v55 = vsel %vm197_vm4, %v319_v57, 0.0  ;;  %v430_v15 = vmul.f32 %v355_v7, %v355_v7  ;;  %v455_v59 = vadd.f32 %v454_v2, %v453_v53 }
 0x181   :  { %v429_v17 = vmul.f32 %v354_v55, %v354_v55 }
 0x182   :  { %v458_v62 = vsel %vm374_vm3, %v430_v15, 0.0 }
 0x183   :  { %v456_v60 = vsel %vm374_vm3, %v429_v17, 0.0 }
 0x184   :  { %v457_v61 = vadd.f32 %v456_v60, %v455_v59 }
 0x186   :  { %v459_v63 = vadd.f32 %v458_v62, %v457_v61 }
 0x187   :  { %v325_v16 = vpop.permute.xlu0 %324 }
 0x188   :  { %v357_v18 = vsel %vm197_vm4, %v325_v16, 0.0  ;;  %v461_v22 = vadd.f32 %v460_v19, %v459_v63 }
 0x189   :  { %v432_v20 = vmul.f32 %v357_v18, %v357_v18 }
 0x18b   :  { %v462_v21 = vsel %vm374_vm3, %v432_v20, 0.0 }
 0x18c   :  { %v463_v23 = vadd.f32 %v462_v21, %v461_v22 }
 0x18e   :  { %464 = vadd.xlane.f32.xlu2 %v463_v23 }
 0x1aa   :  { %v407_v24 = vpop.xlane.xlu1 %406 }
 0x1ab   :  { %v408_v25 = vrot.slane %v407_v24, 4 }
 0x1ad   :  { %v409_v8 = vadd.f32 %v408_v25, %v407_v24 }
 0x1af   :  { %v410_v26 = vrot.slane %v409_v8, 2 }
 0x1b1   :  { %v411_v27 = vadd.f32 %v410_v26, %v409_v8 }
 0x1b3   :  { %v412_v10 = vrot.slane %v411_v27, 1 }
 0x1b5   :  { %v413_v28 = vadd.f32 %v412_v10, %v411_v27 }
 0x1b7   :  { %507 = vpush %v413_v28 }
 0x1e8   :  { %s508_s20 = spop %507 }
 0x1e9   :  { %v415_v34 = vstv %s508_s20 }
 0x1ea   :  { %416 = vst [vmem:[#allocation2] sm:$0xff] %v415_v34 }
 0x1eb   :  { %485 = dma.vmem_to_hbm [thread:$0]  %s481_s16, 128, %s483_s19, [#allocation3]  }
 0x201   :  { %v465_v29 = vpop.xlane.xlu2 %464 }
 0x202   :  { %v466_v30 = vrot.slane %v465_v29, 4 }
 0x204   :  { %v467_v6 = vadd.f32 %v466_v30, %v465_v29 }
 0x206   :  { %v468_v4 = vrot.slane %v467_v6, 2 }
 0x208   :  { %v469_v31 = vadd.f32 %v468_v4, %v467_v6 }
 0x20a   :  { %v470_v32 = vrot.slane %v469_v31, 1 }
 0x20c   :  { %v471_v58 = vadd.f32 %v470_v32, %v469_v31 }
 0x20e   :  { %509 = vpush %v471_v58 }
 0x23f   :  { %s510_s26 = spop %509 }
 0x240   :  { %v473_v35 = vstv %s510_s26 }
 0x241   :  { %474 = vst [vmem:[#allocation4] sm:$0xff] %v473_v35 }
 0x242   :  { %496 = dma.vmem_to_hbm [thread:$0]  %s492_s22, 128, %s494_s25, [#allocation5]  }
 0x243   :  { %564 = dma.done.wait [#allocation3], 128  }
 0x244   :  { %565 = vsyncadd [#allocation3], 4294967168 }
 0x245   :  { %566 = dma.done.wait [#allocation5], 128  }
 0x246   :  { %567 = vsyncadd [#allocation5], 4294967168 }
 0x247   :  { %505 = vsyncpa [#allocation3], 1 }
 0x248   :  { %506 = vsyncpa [#allocation5], 1 }

</bundles_post_ra>
